<compile_context>
chip_gen: v7x
topology: tpu7x:2x2x1
jax: 0.10.0
libtpu: 0.0.40
codegen_flags: <defaults>
</compile_context>

<pallas_src>
import functools

import jax
import jax.numpy as jnp
from jax.experimental import pallas as pl
from jax.experimental.pallas import tpu as pltpu


def _ssdp_kernel(params_ref,            # SMEM scalar-prefetch: [a_scale, A_baseline, neg_inv_two_sigma_sq]
                 pre_ref,               # (B_blk, 1, C_in)      VMEM
                 post_ref,              # (B_blk, C_out, 1)     VMEM
                 dt_ref,                # (B_blk, C_out, C_in)  VMEM (storage dtype)
                 out_ref,               # (C_out, C_in)         VMEM, resident accumulator / output
                 *, inv_batch):
    blk = pl.program_id(0)

    @pl.when(blk == 0)
    def _():
        out_ref[...] = jnp.zeros_like(out_ref)

    a_scale = params_ref[0]        # A_plus + A_baseline
    a_baseline = params_ref[1]     # A_baseline
    neg_inv_2s2 = params_ref[2]    # -1 / (2 * sigma^2)
    # NOTE: A_minus is a module parameter but is unused in forward() (matches reference).

    pre = pre_ref[...]                                   # (B_blk, 1, C_in)
    post = post_ref[...]                                 # (B_blk, C_out, 1)
    dt = dt_ref[...].astype(jnp.float32)                 # (B_blk, C_out, C_in)

    sync = post * pre                                    # (B_blk, C_out, C_in)
    gauss = jnp.exp(dt * dt * neg_inv_2s2)               # EUP exp, no divide
    dw = gauss * (a_scale * sync - a_baseline)

    # One accumulator update per batch block (in-block reduction over batch).
    out_ref[...] += jnp.sum(dw, axis=0)

    @pl.when(blk == pl.num_programs(0) - 1)
    def _():
        out_ref[...] = jnp.clip(out_ref[...] * inv_batch, -1.0, 1.0)


def ssdp_forward(pre_spike, post_spike, delta_t,
                 a_plus, a_minus, a_baseline, sigma,
                 *, block_b=None):
    """Pallas implementation of SSDPModule.forward. Returns delta_w [C_out, C_in]."""
    B, C_in = pre_spike.shape
    _, C_out = post_spike.shape
    assert delta_t.shape == (B, C_out, C_in)

    # ---- choose batch block size: largest block whose (double-buffered) delta_t
    # stream stays well inside the scoped-VMEM defaults on all generations.
    dt_itemsize = jnp.dtype(delta_t.dtype).itemsize
    bytes_per_sample = C_out * C_in * dt_itemsize
    budget_per_buffer = 5 * 1024 * 1024          # ~10 MiB double-buffered for delta_t
    if block_b is None:
        block_b = max(1, min(B, budget_per_buffer // max(bytes_per_sample, 1)))
    num_blocks = pl.cdiv(B, block_b)
    B_pad = num_blocks * block_b

    # ---- pad batch if needed; delta_t padded with +inf => gauss == 0 => zero contribution.
    if B_pad != B:
        pad = B_pad - B
        pre_spike = jnp.pad(pre_spike, ((0, pad), (0, 0)))
        post_spike = jnp.pad(post_spike, ((0, pad), (0, 0)))
        delta_t = jnp.pad(delta_t, ((0, pad), (0, 0), (0, 0)),
                          constant_values=jnp.inf)

    # ---- layout: pre lane-resident, post sublane-resident (cheap broadcasts in-kernel).
    pre3 = pre_spike.astype(jnp.float32).reshape(B_pad, 1, C_in)
    post3 = post_spike.astype(jnp.float32).reshape(B_pad, C_out, 1)

    # ---- folded scalar parameters (works for python floats or traced scalars).
    a_plus = jnp.asarray(a_plus, jnp.float32)
    a_baseline = jnp.asarray(a_baseline, jnp.float32)
    sigma = jnp.asarray(sigma, jnp.float32)
    params = jnp.stack([a_plus + a_baseline,
                        a_baseline,
                        -1.0 / (2.0 * sigma * sigma)])

    kernel = functools.partial(_ssdp_kernel, inv_batch=1.0 / float(B))

    return pl.pallas_call(
        kernel,
        out_shape=jax.ShapeDtypeStruct((C_out, C_in), jnp.float32),
        grid_spec=pltpu.PrefetchScalarGridSpec(
            num_scalar_prefetch=1,
            grid=(num_blocks,),
            in_specs=[
                pl.BlockSpec((block_b, 1, C_in), lambda b, p: (b, 0, 0)),
                pl.BlockSpec((block_b, C_out, 1), lambda b, p: (b, 0, 0)),
                pl.BlockSpec((block_b, C_out, C_in), lambda b, p: (b, 0, 0)),
            ],
            # Same output block for every grid step -> stays VMEM-resident (accumulator).
            out_specs=pl.BlockSpec((C_out, C_in), lambda b, p: (0, 0)),
        ),
        compiler_params=pltpu.CompilerParams(
            dimension_semantics=("arbitrary",),  # batch is a reduction axis
        ),
    )(params, pre3, post3, delta_t)


def ssdp_reference(pre_spike, post_spike, delta_t, a_plus, a_baseline, sigma):
    sync = post_spike[:, :, None] * pre_spike[:, None, :]
    gauss = jnp.exp(-delta_t.astype(jnp.float32) ** 2 / (2.0 * sigma ** 2))
    dw = a_plus * sync * gauss - a_baseline * (1.0 - sync) * gauss
    return jnp.clip(dw.mean(axis=0), -1.0, 1.0)


if __name__ == "__main__":
    # Deterministic parameter init matching SSDPModule.__init__ defaults.
    A_plus = 0.00015
    A_minus = 0.0001      # present in module but unused in forward
    A_baseline = 5e-05
    sigma = 1.0

    # Small shapes consistent with a dense_2 layer: input_dim=128, output_dim=16, batch=8.
    B, C_in, C_out = 8, 128, 16
    key = jax.random.PRNGKey(0)
    k1, k2, k3 = jax.random.split(key, 3)

    pre_spike = (jax.random.uniform(k1, (B, C_in)) > 0.5).astype(jnp.float32)
    post_spike = (jax.random.uniform(k2, (B, C_out)) > 0.5).astype(jnp.float32)
    delta_t = jax.random.uniform(k3, (B, C_out, C_in), minval=0.0, maxval=3.0).astype(jnp.float32)

    out = ssdp_forward(pre_spike, post_spike, delta_t, A_plus, A_minus, A_baseline, sigma)
    out = jax.block_until_ready(out)

    ref = ssdp_reference(pre_spike, post_spike, delta_t, A_plus, A_baseline, sigma)
    assert out.shape == (C_out, C_in)
    assert jnp.allclose(out, ref, atol=1e-6, rtol=1e-5), "mismatch vs. JAX reference"

    # Also exercise a batch that does not divide the block size (padding path).
    B2 = 11
    k4, k5, k6 = jax.random.split(jax.random.PRNGKey(1), 3)
    pre2 = (jax.random.uniform(k4, (B2, C_in)) > 0.5).astype(jnp.float32)
    post2 = (jax.random.uniform(k5, (B2, C_out)) > 0.5).astype(jnp.float32)
    dt2 = jax.random.uniform(k6, (B2, C_out, C_in), minval=0.0, maxval=3.0).astype(jnp.float32)
    out2 = jax.block_until_ready(
        ssdp_forward(pre2, post2, dt2, A_plus, A_minus, A_baseline, sigma, block_b=4))
    ref2 = ssdp_reference(pre2, post2, dt2, A_plus, A_baseline, sigma)
    assert jnp.allclose(out2, ref2, atol=1e-6, rtol=1e-5), "mismatch vs. JAX reference (padded)"

    print("KERNEL_OK")
</pallas_src>

<mosaic_0001>
module attributes {stable_mosaic.version = 11 : i64} {
  func.func @_ssdp_kernel(%arg0: i32, %arg1: memref<3xf32, #tpu.memory_space<smem>>, %arg2: memref<8x1x128xf32, #tpu.memory_space<vmem>>, %arg3: memref<8x16x1xf32, #tpu.memory_space<vmem>>, %arg4: memref<8x16x128xf32, #tpu.memory_space<vmem>>, %arg5: memref<16x128xf32, #tpu.memory_space<vmem>>) attributes {dimension_semantics = [#tpu.dimension_semantics<arbitrary>], iteration_bounds = array<i64: 1>, scalar_prefetch = 1 : i64, scratch_operands = 0 : i64, tpu.core_type = #tpu.core_type<tc>, window_params = [{transform_indices = @transform_0, window_bounds = array<i64: 8, 1, 128>}, {transform_indices = @transform_1, window_bounds = array<i64: 8, 16, 1>}, {transform_indices = @transform_2, window_bounds = array<i64: 8, 16, 128>}, {pipeline_mode = #tpu.pipeline_mode<synchronous>, transform_indices = @transform_3, window_bounds = array<i64: 16, 128>}]} {
    %c0_i32 = arith.constant 0 : i32
    %0 = arith.cmpi eq, %arg0, %c0_i32 : i32
    %1 = arith.extui %0 : i1 to i32
    %c0_i32_0 = arith.constant 0 : i32
    %2 = arith.cmpi ne, %1, %c0_i32_0 : i32
    scf.if %2 {
      %cst_16 = arith.constant 0.000000e+00 : f32
      %28 = vector.broadcast %cst_16 : f32 to vector<16x128xf32>
      %c0_17 = arith.constant 0 : index
      %c0_18 = arith.constant 0 : index
      %29 = vector.load %arg5[%c0_17, %c0_18] : memref<16x128xf32, #tpu.memory_space<vmem>>, vector<16x128xf32>
      tpu.vector_store %arg5[%c0_17, %c0_18], %28 {strides = array<i32>} : memref<16x128xf32, #tpu.memory_space<vmem>>, vector<16x128xf32>,
    } else {
    }
    %c0 = arith.constant 0 : index
    %3 = memref.load %arg1[%c0] : memref<3xf32, #tpu.memory_space<smem>>
    %c1 = arith.constant 1 : index
    %4 = memref.load %arg1[%c1] : memref<3xf32, #tpu.memory_space<smem>>
    %c2 = arith.constant 2 : index
    %5 = memref.load %arg1[%c2] : memref<3xf32, #tpu.memory_space<smem>>
    %c0_1 = arith.constant 0 : index
    %c0_2 = arith.constant 0 : index
    %c0_3 = arith.constant 0 : index
    %6 = vector.load %arg2[%c0_1, %c0_2, %c0_3] : memref<8x1x128xf32, #tpu.memory_space<vmem>>, vector<8x1x128xf32>
    %c0_4 = arith.constant 0 : index
    %c0_5 = arith.constant 0 : index
    %c0_6 = arith.constant 0 : index
    %7 = vector.load %arg3[%c0_4, %c0_5, %c0_6] : memref<8x16x1xf32, #tpu.memory_space<vmem>>, vector<8x16x1xf32>
    %c0_7 = arith.constant 0 : index
    %c0_8 = arith.constant 0 : index
    %c0_9 = arith.constant 0 : index
    %8 = vector.load %arg4[%c0_7, %c0_8, %c0_9] : memref<8x16x128xf32, #tpu.memory_space<vmem>>, vector<8x16x128xf32>
    %9 = vector.broadcast %7 : vector<8x16x1xf32> to vector<8x16x128xf32>
    %10 = vector.broadcast %6 : vector<8x1x128xf32> to vector<8x16x128xf32>
    %11 = arith.mulf %9, %10 : vector<8x16x128xf32>
    %12 = arith.mulf %8, %8 : vector<8x16x128xf32>
    %13 = vector.broadcast %5 : f32 to vector<8x16x128xf32>
    %14 = arith.mulf %12, %13 : vector<8x16x128xf32>
    %15 = math.exp %14 : vector<8x16x128xf32>
    %16 = vector.broadcast %3 : f32 to vector<8x16x128xf32>
    %17 = arith.mulf %16, %11 : vector<8x16x128xf32>
    %18 = vector.broadcast %4 : f32 to vector<8x16x128xf32>
    %19 = arith.subf %17, %18 : vector<8x16x128xf32>
    %20 = arith.mulf %15, %19 : vector<8x16x128xf32>
    %c0_10 = arith.constant 0 : index
    %c0_11 = arith.constant 0 : index
    %21 = vector.load %arg5[%c0_10, %c0_11] : memref<16x128xf32, #tpu.memory_space<vmem>>, vector<16x128xf32>
    %cst = arith.constant dense<0.000000e+00> : vector<16x128xf32>
    %22 = vector.multi_reduction <add>, %20, %cst [0] : vector<8x16x128xf32> to vector<16x128xf32>
    %23 = arith.addf %21, %22 : vector<16x128xf32>
    %c0_12 = arith.constant 0 : index
    %c0_13 = arith.constant 0 : index
    %24 = vector.load %arg5[%c0_12, %c0_13] : memref<16x128xf32, #tpu.memory_space<vmem>>, vector<16x128xf32>
    tpu.vector_store %arg5[%c0_12, %c0_13], %23 {strides = array<i32>} : memref<16x128xf32, #tpu.memory_space<vmem>>, vector<16x128xf32>,
    %c0_i32_14 = arith.constant 0 : i32
    %25 = arith.cmpi eq, %arg0, %c0_i32_14 : i32
    %26 = arith.extui %25 : i1 to i32
    %c0_i32_15 = arith.constant 0 : i32
    %27 = arith.cmpi ne, %26, %c0_i32_15 : i32
    scf.if %27 {
      %c0_16 = arith.constant 0 : index
      %c0_17 = arith.constant 0 : index
      %28 = vector.load %arg5[%c0_16, %c0_17] : memref<16x128xf32, #tpu.memory_space<vmem>>, vector<16x128xf32>
      %cst_18 = arith.constant 1.250000e-01 : f32
      %29 = vector.broadcast %cst_18 : f32 to vector<16x128xf32>
      %30 = arith.mulf %28, %29 : vector<16x128xf32>
      %cst_19 = arith.constant -1.000000e+00 : f32
      %cst_20 = arith.constant 1.000000e+00 : f32
      %31 = vector.broadcast %cst_19 : f32 to vector<16x128xf32>
      %32 = arith.maximumf %31, %30 : vector<16x128xf32>
      %33 = vector.broadcast %cst_20 : f32 to vector<16x128xf32>
      %34 = arith.minimumf %33, %32 : vector<16x128xf32>
      %c0_21 = arith.constant 0 : index
      %c0_22 = arith.constant 0 : index
      %35 = vector.load %arg5[%c0_21, %c0_22] : memref<16x128xf32, #tpu.memory_space<vmem>>, vector<16x128xf32>
      tpu.vector_store %arg5[%c0_21, %c0_22], %34 {strides = array<i32>} : memref<16x128xf32, #tpu.memory_space<vmem>>, vector<16x128xf32>,
    } else {
    }
    return
  }
  func.func @transform_0(%arg0: i32, %arg1: memref<3xf32, #tpu.memory_space<smem>>) -> (i32, i32, i32) {
    %c0_i32 = arith.constant 0 : i32
    %c0_i32_0 = arith.constant 0 : i32
    %c0_i32_1 = arith.constant 0 : i32
    return %arg0, %c0_i32, %c0_i32_0 : i32, i32, i32
  }
  func.func @transform_1(%arg0: i32, %arg1: memref<3xf32, #tpu.memory_space<smem>>) -> (i32, i32, i32) {
    %c0_i32 = arith.constant 0 : i32
    %c0_i32_0 = arith.constant 0 : i32
    %c0_i32_1 = arith.constant 0 : i32
    return %arg0, %c0_i32, %c0_i32_0 : i32, i32, i32
  }
  func.func @transform_2(%arg0: i32, %arg1: memref<3xf32, #tpu.memory_space<smem>>) -> (i32, i32, i32) {
    %c0_i32 = arith.constant 0 : i32
    %c0_i32_0 = arith.constant 0 : i32
    %c0_i32_1 = arith.constant 0 : i32
    return %arg0, %c0_i32, %c0_i32_0 : i32, i32, i32
  }
  func.func @transform_3(%arg0: i32, %arg1: memref<3xf32, #tpu.memory_space<smem>>) -> (i32, i32) {
    %c0_i32 = arith.constant 0 : i32
    %c0_i32_0 = arith.constant 0 : i32
    %c0_i32_1 = arith.constant 0 : i32
    return %c0_i32, %c0_i32_0 : i32, i32
  }
}

</mosaic_0001>

<bundles_post_ra>
// kernel: tpu_custom_call.1
= control target key start
LH: loop header
LB: loop body
LE: loop exit
PB: predicated region body
PF: predicated region fallthrough
CT: control target
= control target key end

     0   :  { %s694_s0 = inlined_call_operand.vmem [shape: f32[3], index: 0, kind: input, shape index: {}]   ;;  %s695_s1 = inlined_call_operand.vmem [shape: f32[8,1,128], index: 1, kind: input, shape index: {}]   ;;  %s696_s2 = inlined_call_operand.vmem [shape: f32[8,16,1], index: 2, kind: input, shape index: {}]   ;;  %s697_s3 = inlined_call_operand.vmem [shape: f32[8,16,128], index: 3, kind: input, shape index: {}]   ;;  %s698_s4 = inlined_call_operand.hbm [shape: f32[16,128], index: 4, kind: output, shape index: {}]  }
   0x1   :  { %s9_s17 = sshll.u32 %s694_s0, 4  ;;  %s10_s17 = int_to_ptr.vmem [resolvable:$true] %s9_s17 }
   0x2   :  { %s431_s18 = scalar_lea.vmem %s10_s17, 16  ;;  %p436_p1 = scmp.lt.s32.totalorder %s10_s17, %s10_s17 }
   0x3   :  { %p432_p0 = scmp.ne.s32.totalorder %s10_s17, %s431_s18  ;;  %p437_p2 = scmp.lt.s32.totalorder %s431_s18, %s431_s18 }
   0x5   :  { %p438_p3 = por %p437_p2, %p436_p1 }
   0x7   :  { %p439_p4 = pnand %p438_p3, %p432_p0 }
   0x9   :  { %442 = shalt.err (!%p439_p4)  }
   0xa   :  { %s469_s19 = smov [#allocation3]  }
   0xb   :  { %12 = dma.vmem_to_smem %s10_s17, 16, %s469_s19, [#allocation2] }
   0xc   :  { %465 = dma.done.wait [#allocation2], 16 }
   0xd   :  { %466 = vsyncadd [#allocation2], 4294967280 }
   0xe   :  { %14 = sfence }
   0xf   :  { %v41_v0 = vld [vmem:[%s696_s2 + $0x10] sm:$0xff]  ;;  %v39_v1 = vld [vmem:[%s696_s2] sm:$0xff]  ;;  %v470_v2 = vmov 0   ;;  %v42_v3 = vld [vmem:[%s696_s2 + $0x18] sm:$0xff] }
  0x10   :  { %398 = vset.pattern.permute.xlu1 %v470_v2  ;;  %397 = vset.pattern.permute.xlu0 %v470_v2  ;;  %v40_v4 = vld [vmem:[%s696_s2 + $0x8] sm:$0xff]  ;;  %v43_v6 = vld [vmem:[%s696_s2 + $0x20] sm:$0xff] }
  0x11   :  { %83 = vperm.xlu1 %398, %v41_v0   ;;  %73 = vperm.xlu0 %397, %v39_v1   ;;  %v44_v5 = vld [vmem:[%s696_s2 + $0x28] sm:$0xff] }
  0x15   :  { %88 = vperm.xlu1 %398, %v42_v3   ;;  %78 = vperm.xlu0 %397, %v40_v4  }
  0x16   :  { %15 = vsyncpa [#allocation5], 0  ;;  %v46_v7 = vld [vmem:[%s696_s2 + $0x38] sm:$0xff]  ;;  %v45_v8 = vld [vmem:[%s696_s2 + $0x30] sm:$0xff]  ;;  %s380_s24 = sld [smem:[#allocation3 + $0x2]]  ;;  %s570_s10 = sld [smem:[#allocation3]] }
  0x17   :  { %v48_v9 = vld [vmem:[%s696_s2 + $0x48] sm:$0xff]  ;;  %v47_v10 = vld [vmem:[%s696_s2 + $0x40] sm:$0xff]  ;;  %v50_v11 = vld [vmem:[%s696_s2 + $0x58] sm:$0xff]  ;;  %s580_s15 = sld [smem:[#allocation3 + $0x1]] }
  0x18   :  { %v49_v12 = vld [vmem:[%s696_s2 + $0x50] sm:$0xff]  ;;  %v52_v13 = vld [vmem:[%s696_s2 + $0x68] sm:$0xff]  ;;  %v51_v14 = vld [vmem:[%s696_s2 + $0x60] sm:$0xff] }
  0x19   :  { %98 = vperm.xlu1 %398, %v44_v5   ;;  %93 = vperm.xlu0 %397, %v43_v6   ;;  %v54_v15 = vld [vmem:[%s696_s2 + $0x78] sm:$0xff]  ;;  %v53_v16 = vld [vmem:[%s696_s2 + $0x70] sm:$0xff]  ;;  %v55_v18 = vld [vmem:[%s697_s3] sm:$0xff] }
  0x1a   :  { %v57_v17 = vld [vmem:[%s697_s3 + $0x10] sm:$0xff]  ;;  %v58_v19 = vld [vmem:[%s697_s3 + $0x18] sm:$0xff]  ;;  %v56_v21 = vld [vmem:[%s697_s3 + $0x8] sm:$0xff]  ;;  %v215_v23 = vmul.f32 %v55_v18, %v55_v18 }
  0x1b   :  { %v217_v20 = vmul.f32 %v57_v17, %v57_v17  ;;  %v218_v24 = vmul.f32 %v58_v19, %v58_v19  ;;  %v60_v25 = vld [vmem:[%s697_s3 + $0x28] sm:$0xff]  ;;  %v216_v26 = vmul.f32 %v56_v21, %v56_v21  ;;  %v59_v27 = vld [vmem:[%s697_s3 + $0x20] sm:$0xff]  ;;  %v62_v29 = vld [vmem:[%s697_s3 + $0x38] sm:$0xff] }
  0x1c   :  { %v562_v22 = vstv %s380_s24  ;;  %v61_v30 = vld [vmem:[%s697_s3 + $0x30] sm:$0xff]  ;;  %v220_v32 = vmul.f32 %v60_v25, %v60_v25  ;;  %v219_v34 = vmul.f32 %v59_v27, %v59_v27  ;;  %v64_v35 = vld [vmem:[%s697_s3 + $0x48] sm:$0xff]  ;;  %v63_v36 = vld [vmem:[%s697_s3 + $0x40] sm:$0xff]  ;;  %v222_v38 = vmul.f32 %v62_v29, %v62_v29 }
  0x1d   :  { %108 = vperm.xlu1 %398, %v46_v7   ;;  %103 = vperm.xlu0 %397, %v45_v8   ;;  %v234_v28 = vmul.f32 %v562_v22, %v217_v20  ;;  %v232_v31 = vmul.f32 %v562_v22, %v215_v23  ;;  %v235_v33 = vmul.f32 %v562_v22, %v218_v24  ;;  %v66_v41 = vld [vmem:[%s697_s3 + $0x58] sm:$0xff]  ;;  %v65_v48 = vld [vmem:[%s697_s3 + $0x50] sm:$0xff]  ;;  %v68_v55 = vld [vmem:[%s697_s3 + $0x68] sm:$0xff]  ;;  %v604_v56 = vstv %s570_s10 }
  0x1e   :  { %v233_v37 = vmul.f32 %v562_v22, %v216_v26  ;;  %v221_v39 = vmul.f32 %v61_v30, %v61_v30  ;;  %v237_v45 = vmul.f32 %v562_v22, %v220_v32  ;;  %v224_v46 = vmul.f32 %v64_v35, %v64_v35  ;;  %v382_v58 = vld [vmem:[%s695_s1 + $0x1] ss:$0 sm:$0xff]  ;;  %v381_v2 = vld [vmem:[%s695_s1] ss:$0 sm:$0xff]  ;;  %v70_v5 = vld [vmem:[%s697_s3 + $0x78] sm:$0xff] }
  0x1f   :  { %v252_v40 = vmul.f32 1.442695, %v234_v28  ;;  %v248_v44 = vmul.f32 1.442695, %v232_v31  ;;  %v223_v47 = vmul.f32 %v63_v36, %v63_v36  ;;  %v254_v49 = vmul.f32 1.442695, %v235_v33 }
  0x20   :  { %v236_v50 = vmul.f32 %v562_v22, %v219_v34  ;;  %v250_v51 = vmul.f32 1.442695, %v233_v37  ;;  %v239_v52 = vmul.f32 %v562_v22, %v222_v38  ;;  %v238_v53 = vmul.f32 %v562_v22, %v221_v39  ;;  %v67_v0 = vld [vmem:[%s697_s3 + $0x60] sm:$0xff] }
  0x21   :  { %118 = vperm.xlu1 %398, %v48_v9   ;;  %113 = vperm.xlu0 %397, %v47_v10   ;;  %v226_v54 = vmul.f32 %v66_v41, %v66_v41  ;;  %399 = vpow2.f32 %v252_v40  ;;  %v225_v57 = vmul.f32 %v65_v48, %v65_v48  ;;  %v258_v61 = vmul.f32 1.442695, %v237_v45  ;;  %v69_v9 = vld [vmem:[%s697_s3 + $0x70] sm:$0xff]  ;;  %v384_v26 = vld [vmem:[%s695_s1 + $0x3] ss:$0 sm:$0xff] }
  0x22   :  { %401 = vpow2.f32 %v248_v44  ;;  %v241_v62 = vmul.f32 %v562_v22, %v224_v46  ;;  %v240_v63 = vmul.f32 %v562_v22, %v223_v47  ;;  %v615_v1 = vstv %s580_s15  ;;  %v385_v45 = vld [vmem:[%s695_s1 + $0x4] ss:$0 sm:$0xff] }
  0x23   :  { %403 = vpow2.f32 %v254_v49  ;;  %v256_v3 = vmul.f32 1.442695, %v236_v50  ;;  %v228_v4 = vmul.f32 %v68_v55, %v68_v55  ;;  %v262_v6 = vmul.f32 1.442695, %v239_v52 }
  0x24   :  { %405 = vpow2.f32 %v250_v51  ;;  %v260_v7 = vmul.f32 1.442695, %v238_v53  ;;  %v243_v8 = vmul.f32 %v562_v22, %v226_v54  ;;  %v266_v17 = vmul.f32 1.442695, %v241_v62 }
  0x25   :  { %128 = vperm.xlu1 %398, %v50_v11   ;;  %123 = vperm.xlu0 %397, %v49_v12   ;;  %v383_v12 = vld [vmem:[%s695_s1 + $0x2] ss:$0 sm:$0xff]  ;;  %407 = vpow2.f32 %v258_v61  ;;  %v264_v18 = vmul.f32 1.442695, %v240_v63  ;;  %v230_v19 = vmul.f32 %v70_v5, %v70_v5  ;;  %v245_v21 = vmul.f32 %v562_v22, %v228_v4 }
  0x26   :  { %409 = vpow2.f32 %v256_v3  ;;  %v229_v23 = vmul.f32 %v69_v9, %v69_v9  ;;  %v270_v27 = vmul.f32 1.442695, %v243_v8 }
  0x27   :  { %411 = vpow2.f32 %v262_v6  ;;  %v247_v35 = vmul.f32 %v562_v22, %v230_v19  ;;  %v274_v39 = vmul.f32 1.442695, %v245_v21 }
  0x28   :  { %413 = vpow2.f32 %v260_v7  ;;  %v246_v40 = vmul.f32 %v562_v22, %v229_v23 }
  0x29   :  { %138 = vperm.xlu1 %398, %v52_v13   ;;  %133 = vperm.xlu0 %397, %v51_v14   ;;  %v242_v13 = vmul.f32 %v562_v22, %v225_v57  ;;  %v227_v14 = vmul.f32 %v67_v0, %v67_v0  ;;  %415 = vpow2.f32 %v266_v17  ;;  %v278_v54 = vmul.f32 1.442695, %v247_v35  ;;  %v386_v0 = vld [vmem:[%s695_s1 + $0x5] ss:$0 sm:$0xff] }
  0x2a   :  { %417 = vpow2.f32 %v264_v18 }
  0x2b   :  { %v244_v30 = vmul.f32 %v562_v22, %v227_v14  ;;  %v268_v34 = vmul.f32 1.442695, %v242_v13  ;;  %v400_v36 = vpop.eup %399  ;;  %419 = vpow2.f32 %v270_v27 }
  0x2c   :  { %v402_v41 = vpop.eup %401 }
  0x2d   :  { %148 = vperm.xlu1 %398, %v54_v15   ;;  %143 = vperm.xlu0 %397, %v53_v16   ;;  %v404_v46 = vpop.eup %403  ;;  %v272_v49 = vmul.f32 1.442695, %v244_v30  ;;  %421 = vpow2.f32 %v268_v34 }
  0x2e   :  { %v406_v50 = vpop.eup %405  ;;  %423 = vpow2.f32 %v274_v39 }
  0x2f   :  { %425 = vpow2.f32 %v272_v49 }
  0x30   :  { %427 = vpow2.f32 %v278_v54 }
  0x90   :  { %v84_v42 = vpop.permute.xlu1 %83  ;;  %v74_v43 = vpop.permute.xlu0 %73 }
  0x91   :  { %v201_v20 = vmul.f32 %v382_v58, %v84_v42  ;;  %v199_v24 = vmul.f32 %v381_v2, %v74_v43 }
  0x93   :  { %v283_v37 = vmul.f32 %v604_v56, %v201_v20  ;;  %v281_v42 = vmul.f32 %v604_v56, %v199_v24  ;;  %v387_v20 = vld [vmem:[%s695_s1 + $0x6] ss:$0 sm:$0xff] }
  0x94   :  { %v89_v59 = vpop.permute.xlu1 %88  ;;  %v79_v60 = vpop.permute.xlu0 %78 }
  0x95   :  { %v202_v10 = vmul.f32 %v382_v58, %v89_v59  ;;  %v200_v11 = vmul.f32 %v381_v2, %v79_v60  ;;  %v300_v55 = vsub.f32 %v283_v37, %v615_v1  ;;  %v276_v58 = vmul.f32 1.442695, %v246_v40  ;;  %v408_v59 = vpop.eup %407 }
  0x96   :  { %v298_v60 = vsub.f32 %v281_v42, %v615_v1  ;;  %v410_v2 = vpop.eup %409 }
  0x97   :  { %v284_v28 = vmul.f32 %v604_v56, %v202_v10  ;;  %v282_v29 = vmul.f32 %v604_v56, %v200_v11  ;;  %v412_v6 = vpop.eup %411  ;;  %v316_v13 = vmul.f32 %v400_v36, %v300_v55  ;;  %429 = vpow2.f32 %v276_v58 }
  0x98   :  { %v99_v15 = vpop.permute.xlu1 %98  ;;  %v94_v16 = vpop.permute.xlu0 %93 }
  0x99   :  { %v204_v25 = vmul.f32 %v383_v12, %v99_v15  ;;  %v203_v31 = vmul.f32 %v383_v12, %v94_v16  ;;  %v301_v47 = vsub.f32 %v284_v28, %v615_v1  ;;  %v299_v48 = vsub.f32 %v282_v29, %v615_v1  ;;  %v414_v12 = vpop.eup %413 }
  0x9a   :  { %v416_v15 = vpop.eup %415  ;;  %v314_v16 = vmul.f32 %v402_v41, %v298_v60  ;;  %v388_v41 = vld [vmem:[%s695_s1 + $0x7] ss:$0 sm:$0xff]  ;;  %s471_s1 = smov [#allocation4]  }
  0x9b   :  { %v286_v43 = vmul.f32 %v604_v56, %v204_v25  ;;  %v285_v22 = vmul.f32 %v604_v56, %v203_v31  ;;  %v317_v3 = vmul.f32 %v404_v46, %v301_v47  ;;  %v315_v4 = vmul.f32 %v406_v50, %v299_v48  ;;  %v418_v25 = vpop.eup %417  ;;  %s368_s19 = sshll.u32 %s471_s1, 4  ;;  %s369_s19 = int_to_ptr.vmem [resolvable:$true] %s368_s19 }
  0x9c   :  { %v109_v32 = vpop.permute.xlu1 %108  ;;  %v104_v33 = vpop.permute.xlu0 %103  ;;  %v332_v37 = vadd.f32 %v316_v13, %v314_v16  ;;  %s443_s20 = scalar_lea.vmem %s369_s19, 256  ;;  %p448_p6 = scmp.lt.s32.totalorder %s369_s19, %s369_s19 }
  0x9d   :  { %v206_v38 = vmul.f32 %v384_v26, %v109_v32  ;;  %v205_v44 = vmul.f32 %v384_v26, %v104_v33  ;;  %v303_v61 = vsub.f32 %v286_v43, %v615_v1  ;;  %v302_v7 = vsub.f32 %v285_v22, %v615_v1  ;;  %v420_v32 = vpop.eup %419  ;;  %p444_p5 = scmp.ne.s32.totalorder %s369_s19, %s443_s20  ;;  %p449_p7 = scmp.lt.s32.totalorder %s443_s20, %s443_s20 }
  0x9e   :  { %v339_v21 = vadd.f32 %v317_v3, %v315_v4  ;;  %v422_v36 = vpop.eup %421 }
  0x9f   :  { %v288_v51 = vmul.f32 %v604_v56, %v206_v38  ;;  %v287_v62 = vmul.f32 %v604_v56, %v205_v44  ;;  %v319_v17 = vmul.f32 %v408_v59, %v303_v61  ;;  %v318_v26 = vmul.f32 %v410_v2, %v302_v7  ;;  %v424_v42 = vpop.eup %423  ;;  %p450_p8 = por %p449_p7, %p448_p6 }
  0xa0   :  { %v119_v52 = vpop.permute.xlu1 %118  ;;  %v114_v53 = vpop.permute.xlu0 %113 }
  0xa1   :  { %v208_v57 = vmul.f32 %v385_v45, %v119_v52  ;;  %v207_v63 = vmul.f32 %v385_v45, %v114_v53  ;;  %v305_v8 = vsub.f32 %v288_v51, %v615_v1  ;;  %v304_v18 = vsub.f32 %v287_v62, %v615_v1  ;;  %v426_v22 = vpop.eup %425  ;;  %p451_p9 = pnand %p450_p8, %p444_p5 }
  0xa2   :  { %v340_v38 = vadd.f32 %v339_v21, %v319_v17  ;;  %v333_v46 = vadd.f32 %v332_v37, %v318_v26  ;;  %v428_v59 = vpop.eup %427 }
  0xa3   :  { %v290_v5 = vmul.f32 %v604_v56, %v208_v57  ;;  %v289_v9 = vmul.f32 %v604_v56, %v207_v63  ;;  %v321_v27 = vmul.f32 %v412_v6, %v305_v8  ;;  %v320_v39 = vmul.f32 %v414_v12, %v304_v18  ;;  %v430_v3 = vpop.eup %429 }
  0xa4   :  { %v129_v10 = vpop.permute.xlu1 %128  ;;  %v124_v11 = vpop.permute.xlu0 %123 }
  0xa5   :  { %v210_v14 = vmul.f32 %v386_v0, %v129_v10  ;;  %v209_v19 = vmul.f32 %v386_v0, %v124_v11  ;;  %v307_v23 = vsub.f32 %v290_v5, %v615_v1  ;;  %v306_v28 = vsub.f32 %v289_v9, %v615_v1 }
  0xa6   :  { %v341_v47 = vadd.f32 %v340_v38, %v321_v27  ;;  %v334_v55 = vadd.f32 %v333_v46, %v320_v39 }
  0xa7   :  { %v292_v24 = vmul.f32 %v604_v56, %v210_v14  ;;  %v291_v29 = vmul.f32 %v604_v56, %v209_v19  ;;  %v323_v43 = vmul.f32 %v416_v15, %v307_v23  ;;  %v322_v48 = vmul.f32 %v418_v25, %v306_v28 }
  0xa8   :  { %v139_v30 = vpop.permute.xlu1 %138  ;;  %v134_v31 = vpop.permute.xlu0 %133 }
  0xa9   :  { %v309_v33 = vsub.f32 %v292_v24, %v615_v1  ;;  %v212_v34 = vmul.f32 %v387_v20, %v139_v30  ;;  %v211_v35 = vmul.f32 %v387_v20, %v134_v31  ;;  %v308_v40 = vsub.f32 %v291_v29, %v615_v1 }
  0xaa   :  { %v342_v60 = vadd.f32 %v341_v47, %v323_v43  ;;  %v335_v63 = vadd.f32 %v334_v55, %v322_v48 }
  0xab   :  { %v294_v44 = vmul.f32 %v604_v56, %v212_v34  ;;  %v293_v45 = vmul.f32 %v604_v56, %v211_v35  ;;  %v325_v51 = vmul.f32 %v420_v32, %v309_v33  ;;  %v324_v57 = vmul.f32 %v422_v36, %v308_v40 }
  0xac   :  { %v149_v49 = vpop.permute.xlu1 %148  ;;  %v144_v50 = vpop.permute.xlu0 %143 }
  0xad   :  { %v311_v52 = vsub.f32 %v294_v44, %v615_v1  ;;  %v310_v53 = vsub.f32 %v293_v45, %v615_v1  ;;  %v214_v54 = vmul.f32 %v388_v41, %v149_v49  ;;  %v213_v58 = vmul.f32 %v388_v41, %v144_v50 }
  0xae   :  { %v343_v4 = vadd.f32 %v342_v60, %v325_v51  ;;  %v336_v6 = vadd.f32 %v335_v63, %v324_v57 }
  0xaf   :  { %v327_v61 = vmul.f32 %v424_v42, %v311_v52  ;;  %v296_v62 = vmul.f32 %v604_v56, %v214_v54  ;;  %v326_v0 = vmul.f32 %v426_v22, %v310_v53  ;;  %v295_v2 = vmul.f32 %v604_v56, %v213_v58 }
  0xb1   :  { %v313_v5 = vsub.f32 %v296_v62, %v615_v1  ;;  %v312_v7 = vsub.f32 %v295_v2, %v615_v1  ;;  %v344_v8 = vadd.f32 %v343_v4, %v327_v61  ;;  %v337_v10 = vadd.f32 %v336_v6, %v326_v0 }
  0xb3   :  { %v329_v9 = vmul.f32 %v428_v59, %v313_v5  ;;  %v328_v11 = vmul.f32 %v430_v3, %v312_v7 }
  0xb5   :  { %v345_v12 = vadd.f32 %v344_v8, %v329_v9  ;;  %v338_v13 = vadd.f32 %v337_v10, %v328_v11 }
  0xb7   :  { %v356_v14 = vmul.f32 0.125, %v345_v12  ;;  %v355_v15 = vmul.f32 0.125, %v338_v13 }
  0xb9   :  { %v390_v16 = vclamps-f32 %v356_v14, 1.0  ;;  %v389_v56 = vclamps-f32 %v355_v15, 1.0 }
  0xbb   :  { %362 = vst [vmem:[#allocation4 + $0x8] sm:$0xff] %v390_v16  ;;  %361 = vst [vmem:[#allocation4] sm:$0xff] %v389_v56 }
  0xbc   :  { %454 = shalt.err (!%p451_p9)
}
  0xbd   :  { %s455_s23 = scalar_lea.hbm %s698_s4, 256 }
  0xbe   :  { %p456_p10 = scmp.ne.s32.totalorder %s698_s4, %s455_s23  ;;  %p459_p11 = scmp.lt.u32.totalorder %s455_s23, %s698_s4 }
  0xc0   :  { %p461_p12 = pnand %p459_p11, %p456_p10 }
  0xc2   :  { %464 = shalt.err (!%p461_p12)
}
  0xc3   :  { %s472_s27 = smov 128   ;;  %s473_s28 = smov 8  }
  0xc4   :  { %374 = dma.vmem_to_hbm [thread:$0]  %s369_s19, 256, %s698_s4, [#allocation5], %s472_s27, %s472_s27, %s473_s28  }
  0xc5   :  { %467 = dma.done.wait [#allocation5], 256  }
  0xc6   :  { %468 = vsyncadd [#allocation5], 4294967040 }
  0xc7   :  { %378 = vsyncpa [#allocation5], 1 }

</bundles_post_ra>
